<compile_context>
chip_gen: v5e
topology: v5e:2x2
jax: 0.10.0
libtpu: 0.0.40
codegen_flags: <defaults>
</compile_context>

<pallas_src>
import jax
import jax.numpy as jnp
from jax.experimental import pallas as pl
from jax.experimental.pallas import tpu as pltpu


def _round_up(x, m):
    return (x + m - 1) // m * m


def _generator_kernel(x_ref, w_ref, b_ref, o_ref):
    # x_ref: (TM, E) f32, w_ref: (E, Vp) bf16, b_ref: (1, Vp) f32,
    # o_ref: (TM, Vp) f32
    x = x_ref[...].astype(w_ref.dtype)  # bf16 operands for the MXU
    logits = jnp.dot(x, w_ref[...], preferred_element_type=jnp.float32)
    logits = logits + b_ref[...]  # f32 from here on
    # numerically stable log_softmax over the (padded) vocab axis
    m = jnp.max(logits, axis=-1, keepdims=True)
    shifted = logits - m
    lse = jnp.log(jnp.sum(jnp.exp(shifted), axis=-1, keepdims=True))
    o_ref[...] = (shifted - lse).astype(o_ref.dtype)


def prepare_generator_params(weight, bias, *, compute_dtype=jnp.bfloat16):
    """One-time parameter prep (do this at init, not per forward call).

    weight: [V, E] (PyTorch nn.Linear layout), bias: [V]
    Returns (w_t [E, Vp] compute_dtype, b_p [1, Vp] f32, V).
    Padded vocab columns get a -1e30 bias so they vanish under softmax.
    """
    V, E = weight.shape
    Vp = _round_up(V, 128)  # lane-dense output / weight last dim
    w_pad = jnp.pad(weight.astype(jnp.float32), ((0, Vp - V), (0, 0)))
    w_t = jnp.transpose(w_pad).astype(compute_dtype)  # [E, Vp]
    b_p = jnp.pad(
        bias.astype(jnp.float32), (0, Vp - V), constant_values=-1e30
    ).reshape(1, Vp)
    return w_t, b_p, V


def generator_forward(x, w_t, b_p, vocab_size, *, tm=128,
                      vmem_limit_bytes=48 * 1024 * 1024):
    """F.log_softmax(Linear(E, V)(x), dim=-1) with prepared params.

    x:   [B, S, E] float32
    w_t: [E, Vp]   (prepared, bf16)
    b_p: [1, Vp]   float32 (prepared, -1e30 in padded columns)
    returns [B, S, vocab_size] float32
    """
    B, S, E = x.shape
    Ew, Vp = w_t.shape
    assert Ew == E, "embed dim mismatch between x and prepared weight"

    N = B * S
    # Clamp the row tile so tiny problems become a single grid step; keep it a
    # multiple of 8 (sublane) in all cases.
    tm = max(8, min(tm, _round_up(N, 8)))
    N_pad = _round_up(N, tm)

    x2 = x.reshape(N, E).astype(jnp.float32)
    if N_pad != N:
        x2 = jnp.pad(x2, ((0, N_pad - N), (0, 0)))

    out = pl.pallas_call(
        _generator_kernel,
        out_shape=jax.ShapeDtypeStruct((N_pad, Vp), jnp.float32),
        grid_spec=pltpu.PrefetchScalarGridSpec(
            num_scalar_prefetch=0,
            grid=(N_pad // tm,),
            in_specs=[
                pl.BlockSpec((tm, E), lambda i: (i, 0)),   # row tile of x
                pl.BlockSpec((E, Vp), lambda i: (0, 0)),   # full weight
                pl.BlockSpec((1, Vp), lambda i: (0, 0)),   # full bias
            ],
            out_specs=pl.BlockSpec((tm, Vp), lambda i: (i, 0)),
        ),
        compiler_params=pltpu.CompilerParams(
            dimension_semantics=("parallel",),  # row axis shards across TCs
            vmem_limit_bytes=vmem_limit_bytes,
        ),
    )(x2, w_t, b_p)

    return out[:N, :vocab_size].reshape(B, S, vocab_size)


if __name__ == "__main__":
    # Small shapes implied by the module: embed_dim=32, tgt_vocab_size=64
    B, S, E, V = 2, 8, 32, 64

    key = jax.random.PRNGKey(0)
    kx, kw, kb = jax.random.split(key, 3)

    # Deterministic synthetic parameters (PyTorch nn.Linear-style uniform init)
    bound = 1.0 / (E ** 0.5)
    weight = jax.random.uniform(kw, (V, E), jnp.float32, -bound, bound)
    bias = jax.random.uniform(kb, (V,), jnp.float32, -bound, bound)
    x = jax.random.normal(kx, (B, S, E), jnp.float32)

    w_t, b_p, vocab = prepare_generator_params(weight, bias)
    out = generator_forward(x, w_t, b_p, vocab)
    jax.block_until_ready(out)
    assert out.shape == (B, S, V)

    # Reference at the same (bf16 matmul, f32 accumulate) precision
    logits_ref = jnp.dot(
        x.reshape(B * S, E).astype(jnp.bfloat16),
        weight.T.astype(jnp.bfloat16),
        preferred_element_type=jnp.float32,
    ) + bias
    ref_bf16 = jax.nn.log_softmax(logits_ref, axis=-1).reshape(B, S, V)
    assert jnp.max(jnp.abs(out - ref_bf16)) < 1e-3

    # Loose sanity check against the full-f32 reference
    ref_f32 = jax.nn.log_softmax(x @ weight.T + bias, axis=-1)
    assert jnp.max(jnp.abs(out - ref_f32)) < 1e-1

    print("KERNEL_OK")
</pallas_src>

<mosaic_0001>
module attributes {stable_mosaic.version = 11 : i64} {
  func.func @_generator_kernel(%arg0: i32, %arg1: memref<16x32xf32, #tpu.memory_space<vmem>>, %arg2: memref<32x128xbf16, #tpu.memory_space<vmem>>, %arg3: memref<1x128xf32, #tpu.memory_space<vmem>>, %arg4: memref<16x128xf32, #tpu.memory_space<vmem>>) attributes {dimension_semantics = [#tpu.dimension_semantics<parallel>], iteration_bounds = array<i64: 1>, scalar_prefetch = 0 : i64, scratch_operands = 0 : i64, tpu.core_type = #tpu.core_type<tc>, window_params = [{transform_indices = @transform_0, window_bounds = array<i64: 16, 32>}, {pipeline_mode = #tpu.pipeline_mode<synchronous>, transform_indices = @transform_1, window_bounds = array<i64: 32, 128>}, {pipeline_mode = #tpu.pipeline_mode<synchronous>, transform_indices = @transform_2, window_bounds = array<i64: 1, 128>}, {transform_indices = @transform_3, window_bounds = array<i64: 16, 128>}]} {
    %c0 = arith.constant 0 : index
    %c0_0 = arith.constant 0 : index
    %0 = vector.load %arg1[%c0, %c0_0] : memref<16x32xf32, #tpu.memory_space<vmem>>, vector<16x32xf32>
    %1 = arith.truncf %0 : vector<16x32xf32> to vector<16x32xbf16>
    %c0_1 = arith.constant 0 : index
    %c0_2 = arith.constant 0 : index
    %2 = vector.load %arg2[%c0_1, %c0_2] : memref<32x128xbf16, #tpu.memory_space<vmem>>, vector<32x128xbf16>
    %cst = arith.constant dense<0.000000e+00> : vector<16x128xf32>
    %3 = tpu.matmul %1, %2, %cst {dimension_numbers = #tpu.dot_dimension_numbers<[1], [0], [0], [1], [0, 0, 1, 1], [], []>} : vector<16x32xbf16>, vector<32x128xbf16>, vector<16x128xf32> -> vector<16x128xf32>
    %c0_3 = arith.constant 0 : index
    %c0_4 = arith.constant 0 : index
    %4 = vector.load %arg3[%c0_3, %c0_4] : memref<1x128xf32, #tpu.memory_space<vmem>>, vector<1x128xf32>
    %5 = vector.broadcast %4 : vector<1x128xf32> to vector<16x128xf32>
    %6 = arith.addf %3, %5 : vector<16x128xf32>
    %cst_5 = arith.constant dense<0xFF800000> : vector<16xf32>
    %7 = vector.multi_reduction <maximumf>, %6, %cst_5 [1] : vector<16x128xf32> to vector<16xf32>
    %8 = vector.shape_cast %7 : vector<16xf32> to vector<16x1xf32>
    %9 = vector.broadcast %8 : vector<16x1xf32> to vector<16x128xf32>
    %10 = arith.subf %6, %9 : vector<16x128xf32>
    %11 = math.exp %10 : vector<16x128xf32>
    %cst_6 = arith.constant dense<0.000000e+00> : vector<16xf32>
    %12 = vector.multi_reduction <add>, %11, %cst_6 [1] : vector<16x128xf32> to vector<16xf32>
    %13 = vector.shape_cast %12 : vector<16xf32> to vector<16x1xf32>
    %14 = math.log %13 : vector<16x1xf32>
    %15 = vector.broadcast %14 : vector<16x1xf32> to vector<16x128xf32>
    %16 = arith.subf %10, %15 : vector<16x128xf32>
    %c0_7 = arith.constant 0 : index
    %c0_8 = arith.constant 0 : index
    %17 = vector.load %arg4[%c0_7, %c0_8] : memref<16x128xf32, #tpu.memory_space<vmem>>, vector<16x128xf32>
    tpu.vector_store %arg4[%c0_7, %c0_8], %16 {strides = array<i32>} : memref<16x128xf32, #tpu.memory_space<vmem>>, vector<16x128xf32>,
    return
  }
  func.func @transform_0(%arg0: i32) -> (i32, i32) {
    %c0_i32 = arith.constant 0 : i32
    %c0_i32_0 = arith.constant 0 : i32
    return %arg0, %c0_i32 : i32, i32
  }
  func.func @transform_1(%arg0: i32) -> (i32, i32) {
    %c0_i32 = arith.constant 0 : i32
    %c0_i32_0 = arith.constant 0 : i32
    %c0_i32_1 = arith.constant 0 : i32
    return %c0_i32, %c0_i32_0 : i32, i32
  }
  func.func @transform_2(%arg0: i32) -> (i32, i32) {
    %c0_i32 = arith.constant 0 : i32
    %c0_i32_0 = arith.constant 0 : i32
    %c0_i32_1 = arith.constant 0 : i32
    return %c0_i32, %c0_i32_0 : i32, i32
  }
  func.func @transform_3(%arg0: i32) -> (i32, i32) {
    %c0_i32 = arith.constant 0 : i32
    %c0_i32_0 = arith.constant 0 : i32
    return %arg0, %c0_i32 : i32, i32
  }
}

</mosaic_0001>

<bundles_post_ra>
// kernel: tpu_custom_call.1
= control target key start
LH: loop header
LB: loop body
LE: loop exit
PB: predicated region body
PF: predicated region fallthrough
CT: control target
= control target key end

     0   :  { %8 = vsyncpa [#allocation3], 0  ;;  %s281_s0 = inlined_call_operand.hbm [shape: f32[16,32], index: 0, kind: input, shape index: {}]   ;;  %s282_s1 = inlined_call_operand.hbm [shape: bf16[32,128], index: 1, kind: input, shape index: {}]   ;;  %s283_s2 = inlined_call_operand.vmem [shape: f32[1,128], index: 2, kind: input, shape index: {}]   ;;  %s284_s3 = inlined_call_operand.hbm [shape: f32[16,128], index: 3, kind: output, shape index: {}]  }
   0x1   :  { %9 = vsyncpa [#allocation6], 0 }
   0x2   :  { %10 = vsyncpa [#allocation4], 0  ;;  %s15_s14 = sshll.u32 %s281_s0, 4  ;;  %s236_s15 = smov [#allocation2]   ;;  %s16_s14 = int_to_ptr.hbm [resolvable:$true] %s15_s14 }
   0x3   :  { %s17_s16 = sshll.u32 %s236_s15, 4  ;;  %s28_s19 = sshll.u32 %s282_s1, 4  ;;  %s18_s16 = int_to_ptr.vmem [resolvable:$true] %s17_s16  ;;  %s29_s19 = int_to_ptr.hbm [resolvable:$true] %s28_s19 }
   0x4   :  { %s237_s20 = smov 128   ;;  %s238_s21 = smov 8  }
   0x5   :  { %23 = dma.hbm_to_vmem [thread:$0]  %s16_s14, 256, %s18_s16, [#allocation3], %s237_s20, %s237_s20, %s238_s21  }
   0x6   :  { %s239_s22 = smov [#allocation5]   ;;  %s240_s24 = smov 64  }
   0x7   :  { %s30_s23 = sshll.u32 %s239_s22, 4  ;;  %s241_s0 = smov 4   ;;  %s31_s23 = int_to_ptr.vmem [resolvable:$true] %s30_s23 }
   0x8   :  { %36 = dma.hbm_to_vmem [thread:$0]  %s29_s19, 256, %s31_s23, [#allocation6], %s240_s24, %s240_s24, %s241_s0  }
   0x9   :  { %230 = dma.done.wait [#allocation3], 256  }
   0xa   :  { %231 = vsyncadd [#allocation3], 4294967040 }
   0xb   :  { %232 = dma.done.wait [#allocation6], 256  }
   0xc   :  { %233 = vsyncadd [#allocation6], 4294967040  ;;  %v141_v0 = vld [vmem:[#allocation5 + $0x8] sm:$0xff]  ;;  %v140_v1 = vld [vmem:[#allocation5] sm:$0xff]  ;;  %vm71_vm0 = vcmask 261120   ;;  %s117_s29 = sshll.u32 %s284_s3, 4  ;;  %s118_s29 = int_to_ptr.hbm [resolvable:$true] %s117_s29 }
   0xd   :  { %81 = vmatpush.bf16.msra.mxu0 %v141_v0  ;;  %v48_v2 = vld [vmem:[#allocation2] sm:$0xff]  ;;  %v49_v3 = vld [vmem:[#allocation2 + $0x8] sm:$0xff] }
   0xe   :  { %v50_v4 = vpack.c.bf16 %v49_v3, %v48_v2  ;;  %v149_v5 = vld [vmem:[%s283_s2] ss:$0 sm:$0xff]  ;;  %s242_s2 = smov [#allocation7]  }
   0xf   :  { %s115_s26 = sshll.u32 %s242_s2, 4  ;;  %s116_s26 = int_to_ptr.vmem [resolvable:$true] %s115_s26 }
  0x11   :  { %82 = vmatpush.bf16.msra.mxu0 %v140_v1 }
  0x14   :  { %139 = vmatmul.msk.bf16.vlgmr.msra.gmra.mxu0 %vm71_vm0, %v50_v4 }
  0x91   :  { %v84_v6 = vpop.f32.mrf.mxu0 }
  0x92   :  { %v85_v7 = vadd.f32 %v149_v5, %v84_v6 }
  0x94   :  { %89 = vmax.xlane.f32.xlu0 %v85_v7 }
  0x99   :  { %v86_v8 = vpop.f32.mrf.mxu0 }
  0x9a   :  { %v87_v9 = vadd.f32 %v149_v5, %v86_v8 }
  0x9c   :  { %91 = vmax.xlane.f32.xlu0 %v87_v9 }
 0x107   :  { %v90_v10 = vpop.xlane.xlu0 %89 }
 0x108   :  { %v93_v11 = vsub.f32 %v85_v7, %v90_v10 }
 0x10a   :  { %v95_v12 = vmul.f32 1.442695, %v93_v11 }
 0x10c   :  { %150 = vpow2.f32 %v95_v12 }
 0x10f   :  { %v92_v13 = vpop.xlane.xlu0 %91 }
 0x110   :  { %v94_v14 = vsub.f32 %v87_v9, %v92_v13 }
 0x112   :  { %v151_v15 = vpop.eup %150  ;;  %v97_v16 = vmul.f32 1.442695, %v94_v14 }
 0x113   :  { %99 = vadd.xlane.f32.xlu1 %v151_v15 }
 0x114   :  { %152 = vpow2.f32 %v97_v16 }
 0x11a   :  { %v153_v17 = vpop.eup %152 }
 0x11b   :  { %101 = vadd.xlane.f32.xlu1 %v153_v17 }
 0x186   :  { %v100_v18 = vpop.xlane.xlu1 %99 }
 0x187   :  { %154 = vlog2.f32 %v100_v18 }
 0x18d   :  { %v155_v19 = vpop.eup %154 }
 0x18e   :  { %v104_v20 = vmul.f32 0.6931472, %v155_v19  ;;  %v102_v21 = vpop.xlane.xlu1 %101 }
 0x18f   :  { %156 = vlog2.f32 %v102_v21 }
 0x190   :  { %v107_v22 = vsub.f32 %v93_v11, %v104_v20 }
 0x192   :  { %109 = vst [vmem:[#allocation7] sm:$0xff] %v107_v22 }
 0x195   :  { %v157_v23 = vpop.eup %156 }
 0x196   :  { %v106_v24 = vmul.f32 0.6931472, %v157_v23 }
 0x198   :  { %v108_v25 = vsub.f32 %v94_v14, %v106_v24 }
 0x19a   :  { %110 = vst [vmem:[#allocation7 + $0x8] sm:$0xff] %v108_v25 }
 0x19b   :  { %123 = dma.vmem_to_hbm [thread:$0]  %s116_s26, 256, %s118_s29, [#allocation4], %s237_s20, %s237_s20, %s238_s21  }
 0x19c   :  { %234 = dma.done.wait [#allocation4], 256  }
 0x19d   :  { %235 = vsyncadd [#allocation4], 4294967040 }
 0x19e   :  { %128 = vsyncpa [#allocation3], 1 }
 0x19f   :  { %129 = vsyncpa [#allocation6], 1 }
 0x1a0   :  { %130 = vsyncpa [#allocation4], 1 }

</bundles_post_ra>
